<compile_context>
chip_gen: v7x
topology: tpu7x:2x2x1
jax: 0.10.0
libtpu: 0.0.40
codegen_flags: <defaults>
</compile_context>

<pallas_src>
import functools

import jax
import jax.numpy as jnp
from jax.experimental import pallas as pl
from jax.experimental.pallas import tpu as pltpu


def _feature_mixing_kernel(x_ref, gamma_ref, beta_ref, wp_ref, w1_ref, w2_ref,
                           b1_ref, bpc_ref, o_ref, *, inv_n):
    x3 = x_ref[...]                                     # (Bt, L, Cin) f32
    bt, l, cin = x3.shape
    cout = o_ref.shape[-1]

    # ---- LayerNorm over (L, Cin) per batch element (two-pass, f32) ----
    row_sum = jnp.sum(x3, axis=-1, keepdims=True)       # (Bt, L, 1)   lane reduce
    mean = jnp.sum(row_sum, axis=1, keepdims=True) * inv_n   # (Bt, 1, 1) sublane reduce
    d = x3 - mean
    row_sq = jnp.sum(d * d, axis=-1, keepdims=True)     # (Bt, L, 1)
    var = jnp.sum(row_sq, axis=1, keepdims=True) * inv_n
    inv = jax.lax.rsqrt(var + 1e-5)
    xn3 = d * inv * gamma_ref[...] + beta_ref[...]      # (Bt, L, Cin) f32

    # ---- flatten (Bt, L) -> M rows so the MXU sees a tall LHS ----
    x2 = x3.reshape(bt * l, cin)
    xn2 = xn3.reshape(bt * l, cin)

    # ---- fc1 + ReLU (bf16 operands, f32 accumulation; dropout p=0) ----
    h = jnp.dot(xn2.astype(jnp.bfloat16), w1_ref[...],
                preferred_element_type=jnp.float32) + b1_ref[...]
    h = jnp.maximum(h, 0.0)

    # ---- projection (residual, kept f32) + fc2 as two accumulating dots ----
    y = jnp.dot(x2, wp_ref[...], preferred_element_type=jnp.float32)
    y = y + jnp.dot(h.astype(jnp.bfloat16), w2_ref[...],
                    preferred_element_type=jnp.float32)
    y = y + bpc_ref[...]                                # (b_proj + b2)

    # norm_after is Identity (normalize_before=True); dropout2 p=0 is identity.
    o_ref[...] = y.reshape(bt, l, cout).astype(o_ref.dtype)


def feature_mixing(x, w_proj, b_proj, gamma, beta, w1, b1, w2, b2,
                   *, target_rows=2048, vmem_budget_bytes=40 << 20,
                   vmem_limit_cap=64 << 20, out_dtype=jnp.float32):
    """_FeatureMixing forward.  x: (B, L, Cin) float.

    Weights are stored transposed for row-major matmuls: w_proj (Cin, Cout),
    w1 (Cin, FF), w2 (FF, Cout); biases are 1-D.

    vmem_budget_bytes / vmem_limit_cap default to values that are safe on
    v7x (64 MiB VMEM).  On v5e / v6e (128 MiB VMEM) both can be raised to
    ~96 MiB for larger per-step batch tiles.  Set out_dtype=jnp.bfloat16 to
    halve output writeback when the consumer accepts bf16."""
    f32, bf16 = jnp.float32, jnp.bfloat16
    x = jnp.asarray(x, f32)
    B, L, Cin = x.shape
    Cout = w_proj.shape[1]
    FF = w1.shape[1]

    def _step_bytes(bt):
        rows = bt * L
        io = 2 * rows * (Cin + Cout) * 4                        # dbl-buffered x / out tiles
        weights = 2 * (2 * L * Cin * 4 + Cin * Cout * 4
                       + Cin * FF * 2 + FF * Cout * 2 + (FF + Cout) * 4)
        interm = rows * (Cin * 12 + FF * 6 + Cout * 8)          # xn, bf16 copies, h, y
        return io + weights + interm

    # ---- batch tile selection ----
    bt = max(1, min(B, target_rows // max(1, L)))
    while bt > 1 and _step_bytes(bt) > vmem_budget_bytes:
        bt = max(1, bt // 2)
    if B >= 2:
        bt = min(bt, -(-B // 2))           # >= 2 grid steps so both v7x TCs get work
    best_div = 1
    for d in range(1, bt + 1):
        if B % d == 0:
            best_div = d
    if best_div * 4 >= bt:                 # divisor of B -> batch pad is a no-op
        bt = best_div
    Bp = -(-B // bt) * bt
    nb = Bp // bt

    xp = x if Bp == B else jnp.pad(x, ((0, Bp - B), (0, 0), (0, 0)))

    gamma = jnp.asarray(gamma, f32).reshape(L, Cin)
    beta = jnp.asarray(beta, f32).reshape(L, Cin)
    wp = jnp.asarray(w_proj, f32)                               # (Cin, Cout) f32
    w1b = jnp.asarray(w1, f32).astype(bf16)                     # (Cin, FF)  bf16
    w2b = jnp.asarray(w2, f32).astype(bf16)                     # (FF, Cout) bf16
    b1v = jnp.asarray(b1, f32).reshape(1, FF)
    bpc = (jnp.asarray(b_proj, f32).reshape(1, Cout)
           + jnp.asarray(b2, f32).reshape(1, Cout))             # fused (b_proj + b2)

    kernel = functools.partial(_feature_mixing_kernel,
                               inv_n=1.0 / float(L * Cin))

    vmem_limit = int(min(vmem_limit_cap, max(32 << 20, 2 * _step_bytes(bt))))

    out = pl.pallas_call(
        kernel,
        out_shape=jax.ShapeDtypeStruct((Bp, L, Cout), out_dtype),
        grid_spec=pltpu.PrefetchScalarGridSpec(
            num_scalar_prefetch=0,
            grid=(nb,),
            in_specs=[
                pl.BlockSpec((bt, L, Cin), lambda b: (b, 0, 0)),   # x tile
                pl.BlockSpec((L, Cin), lambda b: (0, 0)),          # gamma (resident)
                pl.BlockSpec((L, Cin), lambda b: (0, 0)),          # beta  (resident)
                pl.BlockSpec((Cin, Cout), lambda b: (0, 0)),       # W_proj (f32)
                pl.BlockSpec((Cin, FF), lambda b: (0, 0)),         # W1 (bf16)
                pl.BlockSpec((FF, Cout), lambda b: (0, 0)),        # W2 (bf16)
                pl.BlockSpec((1, FF), lambda b: (0, 0)),           # b1
                pl.BlockSpec((1, Cout), lambda b: (0, 0)),         # b_proj + b2
            ],
            out_specs=pl.BlockSpec((bt, L, Cout), lambda b: (b, 0, 0)),
        ),
        compiler_params=pltpu.CompilerParams(
            dimension_semantics=("parallel",),
            vmem_limit_bytes=vmem_limit),
    )(xp, gamma, beta, wp, w1b, w2b, b1v, bpc)

    return out if Bp == B else out[:B]


def feature_mixing_ref(x, w_proj, b_proj, gamma, beta, w1, b1, w2, b2,
                       match_kernel=False):
    """Pure-JAX reference mirroring the PyTorch forward (LayerNorm over
    (L, Cin), normalize_before=True, ReLU, dropout=0).  With match_kernel=True
    it mimics the kernel's bf16-operand fc1/fc2 matmuls (projection stays f32
    in both the kernel and PyTorch)."""
    def mm(a, w, cast):
        if cast:
            a, w = a.astype(jnp.bfloat16), w.astype(jnp.bfloat16)
        return jnp.matmul(a, w, preferred_element_type=jnp.float32)

    x = jnp.asarray(x, jnp.float32)
    x_proj = mm(x, w_proj, cast=False) + jnp.asarray(b_proj).reshape(1, 1, -1)
    mean = jnp.mean(x, axis=(1, 2), keepdims=True)
    var = jnp.mean((x - mean) ** 2, axis=(1, 2), keepdims=True)
    xn = (x - mean) * jax.lax.rsqrt(var + 1e-5) * gamma + beta
    h = jnp.maximum(mm(xn, w1, cast=match_kernel)
                    + jnp.asarray(b1).reshape(1, 1, -1), 0.0)
    y = mm(h, w2, cast=match_kernel) + jnp.asarray(b2).reshape(1, 1, -1)
    return x_proj + y


if __name__ == "__main__":
    root = jax.random.PRNGKey(0)

    def run_case(case_key, B, L, Cin, Cout, FF):
        ks = jax.random.split(case_key, 9)
        x = jax.random.normal(ks[0], (B, L, Cin), dtype=jnp.float32)
        w_proj = 0.1 * jax.random.normal(ks[1], (Cin, Cout), dtype=jnp.float32)
        b_proj = 0.1 * jax.random.normal(ks[2], (Cout,), dtype=jnp.float32)
        gamma = (jnp.ones((L, Cin), jnp.float32)
                 + 0.05 * jax.random.normal(ks[3], (L, Cin), dtype=jnp.float32))
        beta = 0.05 * jax.random.normal(ks[4], (L, Cin), dtype=jnp.float32)
        w1 = 0.1 * jax.random.normal(ks[5], (Cin, FF), dtype=jnp.float32)
        b1 = 0.1 * jax.random.normal(ks[6], (FF,), dtype=jnp.float32)
        w2 = 0.1 * jax.random.normal(ks[7], (FF, Cout), dtype=jnp.float32)
        b2 = 0.1 * jax.random.normal(ks[8], (Cout,), dtype=jnp.float32)

        out = feature_mixing(x, w_proj, b_proj, gamma, beta, w1, b1, w2, b2)
        out = jax.block_until_ready(out)
        assert out.shape == (B, L, Cout)

        # Tight check vs. a reference that mimics the kernel's bf16 fc1/fc2.
        ref_m = feature_mixing_ref(x, w_proj, b_proj, gamma, beta,
                                   w1, b1, w2, b2, match_kernel=True)
        assert jnp.allclose(out, ref_m, atol=5e-3, rtol=5e-3), \
            "mismatch vs kernel-matched reference"

        # Loose check vs. the pure-f32 (PyTorch-semantics) reference.
        ref_f = feature_mixing_ref(x, w_proj, b_proj, gamma, beta,
                                   w1, b1, w2, b2, match_kernel=False)
        assert jnp.allclose(out, ref_f, atol=3e-2, rtol=3e-2), \
            "mismatch vs f32 reference"

    k0, k1 = jax.random.split(root, 2)
    # Small shapes consistent with the module (batch=2, seq=8, channels=4,
    # ff=32, hidden/out=6).  Grid = (2,) with Bt = 1.
    run_case(k0, B=2, L=8, Cin=4, Cout=6, FF=32)
    # A larger batch exercising the batch tiling (Bt = 32, grid = (2,)).
    run_case(k1, B=64, L=8, Cin=4, Cout=6, FF=32)

    print("KERNEL_OK")
</pallas_src>

<mosaic_0001>
module attributes {stable_mosaic.version = 11 : i64} {
  func.func @_feature_mixing_kernel(%arg0: i32, %arg1: memref<1x8x4xf32, #tpu.memory_space<vmem>>, %arg2: memref<8x4xf32, #tpu.memory_space<vmem>>, %arg3: memref<8x4xf32, #tpu.memory_space<vmem>>, %arg4: memref<4x6xf32, #tpu.memory_space<vmem>>, %arg5: memref<4x32xbf16, #tpu.memory_space<vmem>>, %arg6: memref<32x6xbf16, #tpu.memory_space<vmem>>, %arg7: memref<1x32xf32, #tpu.memory_space<vmem>>, %arg8: memref<1x6xf32, #tpu.memory_space<vmem>>, %arg9: memref<1x8x6xf32, #tpu.memory_space<vmem>>) attributes {dimension_semantics = [#tpu.dimension_semantics<parallel>], iteration_bounds = array<i64: 2>, scalar_prefetch = 0 : i64, scratch_operands = 0 : i64, tpu.core_type = #tpu.core_type<tc>, window_params = [{transform_indices = @transform_0, window_bounds = array<i64: 1, 8, 4>}, {pipeline_mode = #tpu.pipeline_mode<synchronous>, transform_indices = @transform_1, window_bounds = array<i64: 8, 4>}, {pipeline_mode = #tpu.pipeline_mode<synchronous>, transform_indices = @transform_2, window_bounds = array<i64: 8, 4>}, {pipeline_mode = #tpu.pipeline_mode<synchronous>, transform_indices = @transform_3, window_bounds = array<i64: 4, 6>}, {pipeline_mode = #tpu.pipeline_mode<synchronous>, transform_indices = @transform_4, window_bounds = array<i64: 4, 32>}, {pipeline_mode = #tpu.pipeline_mode<synchronous>, transform_indices = @transform_5, window_bounds = array<i64: 32, 6>}, {pipeline_mode = #tpu.pipeline_mode<synchronous>, transform_indices = @transform_6, window_bounds = array<i64: 1, 32>}, {pipeline_mode = #tpu.pipeline_mode<synchronous>, transform_indices = @transform_7, window_bounds = array<i64: 1, 6>}, {transform_indices = @transform_8, window_bounds = array<i64: 1, 8, 6>}]} {
    %c0 = arith.constant 0 : index
    %c0_0 = arith.constant 0 : index
    %c0_1 = arith.constant 0 : index
    %0 = vector.load %arg1[%c0, %c0_0, %c0_1] : memref<1x8x4xf32, #tpu.memory_space<vmem>>, vector<1x8x4xf32>
    %cst = arith.constant dense<0.000000e+00> : vector<1x8xf32>
    %1 = vector.multi_reduction <add>, %0, %cst [2] : vector<1x8x4xf32> to vector<1x8xf32>
    %2 = vector.shape_cast %1 : vector<1x8xf32> to vector<1x8x1xf32>
    %cst_2 = arith.constant dense<0.000000e+00> : vector<1x1xf32>
    %3 = vector.multi_reduction <add>, %2, %cst_2 [1] : vector<1x8x1xf32> to vector<1x1xf32>
    %4 = vector.shape_cast %3 : vector<1x1xf32> to vector<1x1x1xf32>
    %cst_3 = arith.constant 3.125000e-02 : f32
    %5 = vector.broadcast %cst_3 : f32 to vector<1x1x1xf32>
    %6 = arith.mulf %4, %5 : vector<1x1x1xf32>
    %7 = vector.broadcast %6 : vector<1x1x1xf32> to vector<1x8x4xf32>
    %8 = arith.subf %0, %7 : vector<1x8x4xf32>
    %9 = arith.mulf %8, %8 : vector<1x8x4xf32>
    %cst_4 = arith.constant dense<0.000000e+00> : vector<1x8xf32>
    %10 = vector.multi_reduction <add>, %9, %cst_4 [2] : vector<1x8x4xf32> to vector<1x8xf32>
    %11 = vector.shape_cast %10 : vector<1x8xf32> to vector<1x8x1xf32>
    %cst_5 = arith.constant dense<0.000000e+00> : vector<1x1xf32>
    %12 = vector.multi_reduction <add>, %11, %cst_5 [1] : vector<1x8x1xf32> to vector<1x1xf32>
    %13 = vector.shape_cast %12 : vector<1x1xf32> to vector<1x1x1xf32>
    %cst_6 = arith.constant 3.125000e-02 : f32
    %14 = vector.broadcast %cst_6 : f32 to vector<1x1x1xf32>
    %15 = arith.mulf %13, %14 : vector<1x1x1xf32>
    %cst_7 = arith.constant 9.99999974E-6 : f32
    %16 = vector.broadcast %cst_7 : f32 to vector<1x1x1xf32>
    %17 = arith.addf %15, %16 : vector<1x1x1xf32>
    %18 = math.rsqrt %17 : vector<1x1x1xf32>
    %19 = vector.broadcast %18 : vector<1x1x1xf32> to vector<1x8x4xf32>
    %20 = arith.mulf %8, %19 : vector<1x8x4xf32>
    %c0_8 = arith.constant 0 : index
    %c0_9 = arith.constant 0 : index
    %21 = vector.load %arg2[%c0_8, %c0_9] : memref<8x4xf32, #tpu.memory_space<vmem>>, vector<8x4xf32>
    %22 = vector.shape_cast %21 : vector<8x4xf32> to vector<1x8x4xf32>
    %23 = arith.mulf %20, %22 : vector<1x8x4xf32>
    %c0_10 = arith.constant 0 : index
    %c0_11 = arith.constant 0 : index
    %24 = vector.load %arg3[%c0_10, %c0_11] : memref<8x4xf32, #tpu.memory_space<vmem>>, vector<8x4xf32>
    %25 = vector.shape_cast %24 : vector<8x4xf32> to vector<1x8x4xf32>
    %26 = arith.addf %23, %25 : vector<1x8x4xf32>
    %27 = vector.shape_cast %0 : vector<1x8x4xf32> to vector<8x4xf32>
    %28 = vector.shape_cast %26 : vector<1x8x4xf32> to vector<8x4xf32>
    %29 = arith.truncf %28 : vector<8x4xf32> to vector<8x4xbf16>
    %c0_12 = arith.constant 0 : index
    %c0_13 = arith.constant 0 : index
    %30 = vector.load %arg5[%c0_12, %c0_13] : memref<4x32xbf16, #tpu.memory_space<vmem>>, vector<4x32xbf16>
    %cst_14 = arith.constant dense<0.000000e+00> : vector<8x32xf32>
    %31 = tpu.matmul %29, %30, %cst_14 {dimension_numbers = #tpu.dot_dimension_numbers<[1], [0], [0], [1], [0, 0, 1, 1], [], []>} : vector<8x4xbf16>, vector<4x32xbf16>, vector<8x32xf32> -> vector<8x32xf32>
    %c0_15 = arith.constant 0 : index
    %c0_16 = arith.constant 0 : index
    %32 = vector.load %arg7[%c0_15, %c0_16] : memref<1x32xf32, #tpu.memory_space<vmem>>, vector<1x32xf32>
    %33 = vector.broadcast %32 : vector<1x32xf32> to vector<8x32xf32>
    %34 = arith.addf %31, %33 : vector<8x32xf32>
    %cst_17 = arith.constant 0.000000e+00 : f32
    %35 = vector.broadcast %cst_17 : f32 to vector<8x32xf32>
    %36 = arith.maximumf %34, %35 : vector<8x32xf32>
    %c0_18 = arith.constant 0 : index
    %c0_19 = arith.constant 0 : index
    %37 = vector.load %arg4[%c0_18, %c0_19] : memref<4x6xf32, #tpu.memory_space<vmem>>, vector<4x6xf32>
    %cst_20 = arith.constant dense<0.000000e+00> : vector<8x6xf32>
    %38 = tpu.matmul %27, %37, %cst_20 {dimension_numbers = #tpu.dot_dimension_numbers<[1], [0], [0], [1], [0, 0, 1, 1], [], []>} : vector<8x4xf32>, vector<4x6xf32>, vector<8x6xf32> -> vector<8x6xf32>
    %39 = arith.truncf %36 : vector<8x32xf32> to vector<8x32xbf16>
    %c0_21 = arith.constant 0 : index
    %c0_22 = arith.constant 0 : index
    %40 = vector.load %arg6[%c0_21, %c0_22] : memref<32x6xbf16, #tpu.memory_space<vmem>>, vector<32x6xbf16>
    %cst_23 = arith.constant dense<0.000000e+00> : vector<8x6xf32>
    %41 = tpu.matmul %39, %40, %cst_23 {dimension_numbers = #tpu.dot_dimension_numbers<[1], [0], [0], [1], [0, 0, 1, 1], [], []>} : vector<8x32xbf16>, vector<32x6xbf16>, vector<8x6xf32> -> vector<8x6xf32>
    %42 = arith.addf %38, %41 : vector<8x6xf32>
    %c0_24 = arith.constant 0 : index
    %c0_25 = arith.constant 0 : index
    %43 = vector.load %arg8[%c0_24, %c0_25] : memref<1x6xf32, #tpu.memory_space<vmem>>, vector<1x6xf32>
    %44 = vector.broadcast %43 : vector<1x6xf32> to vector<8x6xf32>
    %45 = arith.addf %42, %44 : vector<8x6xf32>
    %46 = vector.shape_cast %45 : vector<8x6xf32> to vector<1x8x6xf32>
    %c0_26 = arith.constant 0 : index
    %c0_27 = arith.constant 0 : index
    %c0_28 = arith.constant 0 : index
    %47 = vector.load %arg9[%c0_26, %c0_27, %c0_28] : memref<1x8x6xf32, #tpu.memory_space<vmem>>, vector<1x8x6xf32>
    tpu.vector_store %arg9[%c0_26, %c0_27, %c0_28], %46 {strides = array<i32>} : memref<1x8x6xf32, #tpu.memory_space<vmem>>, vector<1x8x6xf32>,
    return
  }
  func.func @transform_0(%arg0: i32) -> (i32, i32, i32) {
    %c0_i32 = arith.constant 0 : i32
    %c0_i32_0 = arith.constant 0 : i32
    %c0_i32_1 = arith.constant 0 : i32
    return %arg0, %c0_i32, %c0_i32_0 : i32, i32, i32
  }
  func.func @transform_1(%arg0: i32) -> (i32, i32) {
    %c0_i32 = arith.constant 0 : i32
    %c0_i32_0 = arith.constant 0 : i32
    %c0_i32_1 = arith.constant 0 : i32
    return %c0_i32, %c0_i32_0 : i32, i32
  }
  func.func @transform_2(%arg0: i32) -> (i32, i32) {
    %c0_i32 = arith.constant 0 : i32
    %c0_i32_0 = arith.constant 0 : i32
    %c0_i32_1 = arith.constant 0 : i32
    return %c0_i32, %c0_i32_0 : i32, i32
  }
  func.func @transform_3(%arg0: i32) -> (i32, i32) {
    %c0_i32 = arith.constant 0 : i32
    %c0_i32_0 = arith.constant 0 : i32
    %c0_i32_1 = arith.constant 0 : i32
    return %c0_i32, %c0_i32_0 : i32, i32
  }
  func.func @transform_4(%arg0: i32) -> (i32, i32) {
    %c0_i32 = arith.constant 0 : i32
    %c0_i32_0 = arith.constant 0 : i32
    %c0_i32_1 = arith.constant 0 : i32
    return %c0_i32, %c0_i32_0 : i32, i32
  }
  func.func @transform_5(%arg0: i32) -> (i32, i32) {
    %c0_i32 = arith.constant 0 : i32
    %c0_i32_0 = arith.constant 0 : i32
    %c0_i32_1 = arith.constant 0 : i32
    return %c0_i32, %c0_i32_0 : i32, i32
  }
  func.func @transform_6(%arg0: i32) -> (i32, i32) {
    %c0_i32 = arith.constant 0 : i32
    %c0_i32_0 = arith.constant 0 : i32
    %c0_i32_1 = arith.constant 0 : i32
    return %c0_i32, %c0_i32_0 : i32, i32
  }
  func.func @transform_7(%arg0: i32) -> (i32, i32) {
    %c0_i32 = arith.constant 0 : i32
    %c0_i32_0 = arith.constant 0 : i32
    %c0_i32_1 = arith.constant 0 : i32
    return %c0_i32, %c0_i32_0 : i32, i32
  }
  func.func @transform_8(%arg0: i32) -> (i32, i32, i32) {
    %c0_i32 = arith.constant 0 : i32
    %c0_i32_0 = arith.constant 0 : i32
    %c0_i32_1 = arith.constant 0 : i32
    return %arg0, %c0_i32, %c0_i32_0 : i32, i32, i32
  }
}

</mosaic_0001>

<bundles_post_ra>
// kernel: tpu_custom_call.1
= control target key start
LH: loop header
LB: loop body
LE: loop exit
PB: predicated region body
PF: predicated region fallthrough
CT: control target
= control target key end

     0   :  { %s704_s27 = smov 0   ;;  %s759_s0 = inlined_call_operand.vmem [shape: f32[2,8,4], index: 0, kind: input, shape index: {}]   ;;  %s760_s1 = inlined_call_operand.vmem [shape: f32[8,4], index: 1, kind: input, shape index: {}]   ;;  %s761_s2 = inlined_call_operand.vmem [shape: f32[8,4], index: 2, kind: input, shape index: {}]   ;;  %s762_s3 = inlined_call_operand.vmem [shape: f32[4,6], index: 3, kind: input, shape index: {}]   ;;  %s763_s4 = inlined_call_operand.vmem [shape: bf16[4,32], index: 4, kind: input, shape index: {}]   ;;  %s764_s5 = inlined_call_operand.vmem [shape: bf16[32,6], index: 5, kind: input, shape index: {}]   ;;  %s765_s6 = inlined_call_operand.vmem [shape: f32[1,32], index: 6, kind: input, shape index: {}]   ;;  %s766_s7 = inlined_call_operand.vmem [shape: f32[1,6], index: 7, kind: input, shape index: {}]   ;;  %s767_s8 = inlined_call_operand.vmem [shape: f32[2,8,6], index: 8, kind: output, shape index: {}]  }
   0x1 LB: > { %s592_s28 = sadd.s32 4294967295, %s655_s27   ;;  %p596_p0 = scmp.ge.s32.totalorder %s655_s27, 1  ;;  %s655_s27 = sphi %s704_s27, %s18_s27  }
   0x2   : > { %p261_p1 = scmp.lt.s32.totalorder %s655_s27, 3 }
   0x4   : > { %p262_p2 = pnand %p596_p0, %p261_p1 }
   0x5   : > { %p293_p3 = scmp.lt.s32.totalorder (!%p262_p2), %s592_s28, 1  ;;  %vm303_vm0 = vcmask (!%p262_p2), 31744   ;;  %v334_v13 = vld [vmem:[%s763_s4] sm:$0x3] (!%p262_p2)  ;;  %vm345_vm1 = vcmask (!%p262_p2), 1041408   ;;  %v657_v14 = vmov (!%p262_p2), 0.0  }
   0x6   : > { %265 = sbr.rel (%p262_p2) target bundleno = 791 (0x317), region = 52  ;;  %616 = vmatprep.subr.bf16.mxu0 (!%p262_p2), %v657_v14  ;;  %v347_v15 = vsel (!%p262_p2), %vm345_vm1, %v334_v13, 0  ;;  %vm658_vm2 = vmmov (!%p262_p2), 0   ;;  %622 = vmatprep.subr.bf16.mxu1 (!%p262_p2), %v657_v14  ;;  %v329_v26 = vld [vmem:[%s760_s1] sm:$0xff] (!%p262_p2)  ;;  %vm455_vm3 = vcmask (!%p262_p2), 1043456   ;;  %v646_v34 = vld [vmem:[%s764_s5 + $0x8] sm:$0xff] (!%p262_p2)  }
   0x7   : > { %618 = vmatprep.mubr.msk.bf16.mxu0 (!%p262_p2), %vm658_vm2, %v657_v14  ;;  %617 = vmatpush3.bf16.msra.mxu0 (!%p262_p2), %v347_v15  ;;  %v331_v28 = vld [vmem:[%s761_s2] sm:$0xff] (!%p262_p2)  ;;  %vm408_vm4 = vcmask (!%p262_p2), 261120   ;;  %vm537_vm5 = vcmask (!%p262_p2), 48128  }
   0x8   : > { %630 = vmatprep.subr.mxu0 (!%p262_p2), %v657_v14  ;;  %626 = vmatprep.mubr.msk.bf16.mxu1 (!%p262_p2), %vm658_vm2, %v657_v14  ;;  %v390_v32 = vld [vmem:[%s762_s3] sm:$0xf] (!%p262_p2) }
   0x9   : > { %v645_v33 = vld [vmem:[%s764_s5] sm:$0xff] (!%p262_p2)  }
   0xa   : > { %623 = vmatpush3.bf16.msra.mxu1 (!%p262_p2), %v645_v33  ;;  %v599_v35 = vld [vmem:[%s765_s6] ss:$0 sm:$0xff] (!%p262_p2) }
   0xb   : > { %624 = vmatprep.subr.bf16.mxu1 (!%p262_p2), %v657_v14  ;;  %v606_v46 = vld [vmem:[%s766_s7] ss:$0 sm:$0xff] (!%p262_p2) }
   0xd   : > { %s769_s28 = smov (!%p293_p3, %s592_s28), 1 }
   0xe   : > { %s597_s29 = sshll.u32 %s769_s28, 3  ;;  %625 = vmatpush3.bf16.msra.mxu1 %v646_v34 }
   0xf   : > { %s296_s10 = scalar_lea.vmem %s759_s0, %s597_s29 }
  0x10   : > { %v302_v0 = vld [vmem:[%s296_s10] sm:$0xff]  ;;  %s300_s10 = scalar_lea.vmem %s767_s8, %s597_s29 }
  0x11   : > { %v304_v1 = vsel %vm303_vm0, %v302_v0, 0.0 }
  0x12   : > { %305 = vadd.xlane.f32.xlu0 %v304_v1 }
  0x9f   : > { %v306_v2 = vpop.xlane.xlu0 %305 }
  0xa0   : > { %v307_v3 = vrot.slane %v306_v2, 4 }
  0xa2   : > { %v308_v4 = vadd.f32 %v307_v3, %v306_v2 }
  0xa4   : > { %v309_v5 = vrot.slane %v308_v4, 2 }
  0xa6   : > { %v310_v6 = vadd.f32 %v309_v5, %v308_v4 }
  0xa8   : > { %v311_v7 = vrot.slane %v310_v6, 1 }
  0xaa   : > { %v312_v8 = vadd.f32 %v311_v7, %v310_v6 }
  0xac   : > { %v313_v9 = vmul.f32 0.03125, %v312_v8 }
  0xae   : > { %v314_v10 = vsub.f32 %v302_v0, %v313_v9 }
  0xb0   : > { %v315_v11 = vmul.f32 %v314_v10, %v314_v10 }
  0xb2   : > { %v316_v12 = vsel %vm303_vm0, %v315_v11, 0.0 }
  0xb3   : > { %317 = vadd.xlane.f32.xlu0 %v316_v12 }
 0x140   : > { %v318_v16 = vpop.xlane.xlu0 %317 }
 0x141   : > { %v319_v17 = vrot.slane %v318_v16, 4 }
 0x143   : > { %v320_v18 = vadd.f32 %v319_v17, %v318_v16 }
 0x145   : > { %v321_v19 = vrot.slane %v320_v18, 2 }
 0x147   : > { %v322_v20 = vadd.f32 %v321_v19, %v320_v18 }
 0x149   : > { %v323_v21 = vrot.slane %v322_v20, 1 }
 0x14b   : > { %v324_v22 = vadd.f32 %v323_v21, %v322_v20 }
 0x14d   : > { %v325_v23 = vmul.f32 0.03125, %v324_v22 }
 0x14f   : > { %v326_v24 = vadd.f32 1e-05, %v325_v23 }
 0x151   : > { %647 = vrsqrt.f32 %v326_v24 }
 0x15b   : > { %v648_v25 = vpop.eup %647 }
 0x15c   : > { %v328_v27 = vmul.f32 %v648_v25, %v314_v10 }
 0x15e   : > { %v330_v29 = vmul.f32 %v329_v26, %v328_v27 }
 0x160   : > { %v332_v30 = vadd.f32 %v331_v28, %v330_v29 }
 0x162   : > { %v333_v31 = vpack.c.bf16 %v332_v30, %v332_v30 }
 0x164   : > { %619 = vmatmul.mubr.msk.bf16.vlgmr.msra.gmra.mrb[0].mxu0 %vm303_vm0, %v333_v31 }
 0x165   : > { %631 = vmatpush3.msk.msra.mxu0 %vm455_vm3, %v390_v32  ;;  %632 = vmatprep.mubr.msk.f32.mxu0 %vm658_vm2, %v657_v14 }
 0x16c   : > { %633 = vmatmul.mubr.msk.f32.vlgmr.msra.gmra.mrb[4].mxu0 %vm303_vm0, %v302_v0 }
 0x237   : > { %v383_v36 = vpop.f32.mrb[0].mxu0 }
 0x238   : > { %v384_v37 = vadd.f32 %v599_v35, %v383_v36  ;;  %v620_v38 = vpop.f32.mrb[1].mxu0 }
 0x239   : > { %v386_v39 = vpop.f32.mrb[2].mxu0 }
 0x23a   : > { %v389_v40 = vmax.f32 %v384_v37, 0.0  ;;  %v621_v41 = vpop.f32.mrb[3].mxu0 }
 0x23c   : > { %v391_v42 = vpack.c.bf16 %v389_v40, %v389_v40 }
 0x23e   : > { %627 = vmatmul.mubr.msk.bf16.vlgmr.msra.gmra.mrb[0].mxu1 %vm408_vm4, %v391_v42 }
 0x23f   : > { %v525_v43 = vpop.f32.mrb[4].mxu0 }
 0x240   : > { %v634_v44 = vpop.f32.mrb[5].mxu0 }
 0x311   : > { %v446_v45 = vpop.f32.mrb[0].mxu1 }
 0x312   : > { %v526_v47 = vadd.f32 %v525_v43, %v446_v45  ;;  %v628_v48 = vpop.f32.mrb[1].mxu1 }
 0x313   : > { %v449_v49 = vpop.f32.mrb[2].mxu1 }
 0x314   : > { %v536_v50 = vadd.f32 %v606_v46, %v526_v47  ;;  %v629_v51 = vpop.f32.mrb[3].mxu1 }
 0x316   : > { %538 = vst.msk [vmem:[%s300_s10] sm:$0xff] %vm537_vm5, %v536_v50 }
 0x317 PF: > { %s18_s27 = sadd.s32 1, %s655_s27  }
 0x318   : > { %p15_p4 = scmp.ge.s32.totalorder %s18_s27, 4  }
 0x31a   :  { %17 = sbr.rel (!%p15_p4) target bundleno = 1 (0x1), region = 82 }

</bundles_post_ra>
